<compile_context>
chip_gen: v5e
topology: v5e:2x2
jax: 0.10.0
libtpu: 0.0.40
codegen_flags: <defaults>
</compile_context>

<pallas_src>
import jax
import jax.numpy as jnp
from jax.experimental import pallas as pl
from jax.experimental.pallas import tpu as pltpu

DIMS = [(4, 32), (32, 16), (16, 8), (8, 2)]   # (fan_in, fan_out) per layer
D_IN = DIMS[0][0]
D_OUT = DIMS[-1][1]
PAD = 32                                      # every layer padded to 32x32 / 32x1
LANE = 128
FLOPS_PER_SAMPLE = 2 * sum(i * o for i, o in DIMS)   # 1568 flops / sample


def _round_up(x, m):
    return ((x + m - 1) // m) * m


# --------------------------------------------------------------------------- #
# Kernel
# --------------------------------------------------------------------------- #
def mlp_kernel(x_ref, w_ref, b_ref, o_ref):
    """x_ref: (4, T) activations (batch on lanes), w_ref: (4, 32, 32) padded
    weight slab, b_ref: (4, 32, 1) f32 bias slab, o_ref: (2, T) output."""
    x = x_ref[...]
    act = x.dtype                         # bf16 (default) or f32 (exact path)

    # Layer 1: 4 -> 32.  Only the 4 valid input columns of the padded slab.
    h = jnp.dot(w_ref[0][:, 0:D_IN], x, preferred_element_type=jnp.float32)
    h = jnp.maximum(h + b_ref[0], 0.0).astype(act)

    # Layers 2-3 use the full zero-padded (32, 32) weights; padded rows/cols are
    # zero, so the extra sublanes stay exactly zero through bias + ReLU.
    h = jnp.dot(w_ref[1], h, preferred_element_type=jnp.float32)
    h = jnp.maximum(h + b_ref[1], 0.0).astype(act)
    h = jnp.dot(w_ref[2], h, preferred_element_type=jnp.float32)
    h = jnp.maximum(h + b_ref[2], 0.0).astype(act)

    # Layer 4 (no ReLU).  Only the first 2 rows are real outputs; the store along
    # the batch (lane) axis is lane-dense.
    h = jnp.dot(w_ref[3], h, preferred_element_type=jnp.float32) + b_ref[3]
    o_ref[...] = h[0:D_OUT, :].astype(o_ref.dtype)


# --------------------------------------------------------------------------- #
# Parameter packing
# --------------------------------------------------------------------------- #
def pack_params(params, weight_dtype=jnp.bfloat16):
    """params: list of (w [out, in], b [out]) in PyTorch layout.
    Returns zero-padded (4, 32, 32) weight slab (weight_dtype) and a
    (4, 32, 1) f32 bias slab."""
    w_slab = jnp.zeros((len(params), PAD, PAD), weight_dtype)
    b_slab = jnp.zeros((len(params), PAD, 1), jnp.float32)
    for l, (w, b) in enumerate(params):
        out_d, in_d = w.shape
        w_slab = w_slab.at[l, :out_d, :in_d].set(w.astype(weight_dtype))
        b_slab = b_slab.at[l, :out_d, 0].set(b.reshape(-1).astype(jnp.float32))
    return w_slab, b_slab


# --------------------------------------------------------------------------- #
# Tiling / VMEM policy
# --------------------------------------------------------------------------- #
def _vmem_capacity_bytes():
    try:
        return int(pltpu.get_tpu_info().vmem_capacity_bytes)
    except Exception:
        return 64 * 1024 * 1024           # conservative (v7x-sized) fallback


def _pick_tile(bp, tile_b, vmem_cap):
    """Choose the batch tile (lane count per grid step)."""
    if tile_b is None:
        # ~32K lanes fits comfortably in a 48 MiB VMEM budget (v7x, 64 MiB);
        # ~128K lanes in a 96 MiB budget (v5e/v6e, 128 MiB).
        tile_b = 32768 if vmem_cap <= 64 * 1024 * 1024 else 131072
    tile_b = max(LANE, _round_up(tile_b, LANE))
    if bp <= tile_b:
        # Single-step grids leave one TensorCore idle on v7x: split into 2 tiles.
        return min(bp, max(LANE, _round_up(pl.cdiv(bp, 2), LANE)))
    return tile_b


# --------------------------------------------------------------------------- #
# pallas_call runner (batch already lane-padded to a multiple of 128)
# --------------------------------------------------------------------------- #
def _run_feature_major(xT, w_slab, b_slab, *, tile, out_dtype, vmem_limit):
    d_in, bp = xT.shape
    grid = (pl.cdiv(bp, tile),)           # partial last block is clipped by Pallas

    cost = pl.CostEstimate(
        flops=FLOPS_PER_SAMPLE * bp,
        transcendentals=0,
        bytes_accessed=bp * (d_in * xT.dtype.itemsize
                             + D_OUT * jnp.dtype(out_dtype).itemsize)
        + w_slab.size * w_slab.dtype.itemsize + b_slab.size * 4,
    )

    return pl.pallas_call(
        mlp_kernel,
        out_shape=jax.ShapeDtypeStruct((D_OUT, bp), out_dtype),
        grid_spec=pltpu.PrefetchScalarGridSpec(
            num_scalar_prefetch=0,
            grid=grid,
            in_specs=[
                pl.BlockSpec((d_in, tile), lambda i: (0, i)),      # activations
                # Constant index_map: the block index never changes, so the
                # pipeline DMAs the weights / biases once and re-uses them.
                pl.BlockSpec(w_slab.shape, lambda i: (0, 0, 0)),
                pl.BlockSpec(b_slab.shape, lambda i: (0, 0, 0)),
            ],
            out_specs=pl.BlockSpec((D_OUT, tile), lambda i: (0, i)),
        ),
        compiler_params=pltpu.CompilerParams(
            dimension_semantics=("parallel",),   # batch tiles shard across TCs
            vmem_limit_bytes=vmem_limit,
        ),
        cost_estimate=cost,
    )(xT, w_slab, b_slab)


# --------------------------------------------------------------------------- #
# Public entry points
# --------------------------------------------------------------------------- #
def mlp_forward_feature_major(xT, params, *, tile_b=None, out_dtype=None):
    """Fast path: xT is feature-major [4, B]; returns feature-major [2, B].
    No wrapper-side layout traffic (only a lane pad when B % 128 != 0)."""
    d_in, B = xT.shape
    assert d_in == D_IN
    if out_dtype is None:
        out_dtype = xT.dtype

    w_slab, b_slab = pack_params(params, weight_dtype=xT.dtype)
    vmem_cap = _vmem_capacity_bytes()
    vmem_limit = max(32 << 20, min((vmem_cap * 3) // 4, 100 << 20))

    bp = _round_up(B, LANE)
    if bp != B:                           # only for ragged / tiny batches
        xT = jnp.pad(xT, ((0, 0), (0, bp - B)))
    tile = _pick_tile(bp, tile_b, vmem_cap)

    out = _run_feature_major(xT, w_slab, b_slab, tile=tile,
                             out_dtype=out_dtype, vmem_limit=vmem_limit)
    return out[:, :B]


def mlp_forward(x, params, *, stream_dtype=jnp.bfloat16, out_dtype=None,
                tile_b=None):
    """PyTorch-equivalent interface: x [B, 4] -> [B, 2].

    Does one cast+transpose on the input (so the kernel sees lane-dense,
    feature-major blocks) and a tiny [B, 2] transpose on the output.  Callers
    that can keep activations feature-major should use
    mlp_forward_feature_major() to skip even that plumbing."""
    B, d_in = x.shape
    assert d_in == D_IN
    if out_dtype is None:
        out_dtype = stream_dtype

    xT = x.astype(stream_dtype).T                         # (4, B), narrow dtype
    outT = mlp_forward_feature_major(xT, params, tile_b=tile_b,
                                     out_dtype=out_dtype)
    return outT.T                                         # [B, 2]


# --------------------------------------------------------------------------- #
# Init + reference
# --------------------------------------------------------------------------- #
def init_params(key):
    """nn.Linear-style init: uniform(-1/sqrt(fan_in), 1/sqrt(fan_in)), w as [out, in]."""
    params = []
    for fan_in, fan_out in DIMS:
        key, kw, kb = jax.random.split(key, 3)
        bound = 1.0 / float(fan_in) ** 0.5
        w = jax.random.uniform(kw, (fan_out, fan_in), jnp.float32, -bound, bound)
        b = jax.random.uniform(kb, (fan_out,), jnp.float32, -bound, bound)
        params.append((w, b))
    return params


def reference_forward(x, params, quant_dtype=None):
    def q(a):
        if quant_dtype is None:
            return a.astype(jnp.float32)
        return a.astype(quant_dtype).astype(jnp.float32)

    h = q(x)
    for idx, (w, b) in enumerate(params):
        h = h @ q(w).T + b.astype(jnp.float32)
        if idx < len(params) - 1:
            h = jnp.maximum(h, 0.0)
    return h


if __name__ == "__main__":
    key = jax.random.PRNGKey(0)
    kx, kp = jax.random.split(key)
    params = init_params(kp)

    # 1) Exact f32 path, tiny batch (pads to a single 128-lane tile).
    B0 = 8
    x0 = jax.random.normal(kx, (B0, D_IN), jnp.float32)
    out0 = jax.block_until_ready(mlp_forward(x0, params, stream_dtype=jnp.float32))
    ref0 = reference_forward(x0, params)
    assert out0.shape == (B0, D_OUT), out0.shape
    assert jnp.allclose(out0, ref0, atol=1e-5, rtol=1e-5), \
        "f32 path mismatch vs reference"

    # 2) Default bf16 path, ragged batch -> 2 "parallel" grid steps + clipped
    #    partial last block (exercises the megacore / boundary handling).
    B1 = 300
    x1 = jax.random.normal(kx, (B1, D_IN), jnp.float32)
    out1 = jax.block_until_ready(mlp_forward(x1, params))
    ref1 = reference_forward(x1, params, quant_dtype=jnp.bfloat16)
    assert out1.shape == (B1, D_OUT), out1.shape
    assert out1.dtype == jnp.dtype(jnp.bfloat16), out1.dtype
    assert jnp.allclose(out1.astype(jnp.float32), ref1, atol=3e-2, rtol=3e-2), \
        "bf16 path mismatch vs reference"

    # 3) Feature-major fast path (no wrapper layout traffic at all).
    B2 = 512
    x2 = jax.random.normal(kx, (B2, D_IN), jnp.bfloat16)
    out2 = jax.block_until_ready(mlp_forward_feature_major(x2.T, params))
    ref2 = reference_forward(x2.astype(jnp.float32), params,
                             quant_dtype=jnp.bfloat16)
    assert out2.shape == (D_OUT, B2), out2.shape
    assert jnp.allclose(out2.astype(jnp.float32).T, ref2, atol=3e-2, rtol=3e-2), \
        "feature-major path mismatch vs reference"

    print("KERNEL_OK")
</pallas_src>

<mosaic_0001>
module attributes {stable_mosaic.version = 11 : i64} {
  func.func @mlp_kernel(%arg0: i32, %arg1: memref<4x128xf32, #tpu.memory_space<vmem>>, %arg2: memref<4x32x32xf32, #tpu.memory_space<vmem>>, %arg3: memref<4x32x1xf32, #tpu.memory_space<vmem>>, %arg4: memref<2x128xf32, #tpu.memory_space<vmem>>) attributes {dimension_semantics = [#tpu.dimension_semantics<parallel>], iteration_bounds = array<i64: 1>, scalar_prefetch = 0 : i64, scratch_operands = 0 : i64, tpu.core_type = #tpu.core_type<tc>, window_params = [{transform_indices = @transform_0, window_bounds = array<i64: 4, 128>}, {pipeline_mode = #tpu.pipeline_mode<synchronous>, transform_indices = @transform_1, window_bounds = array<i64: 4, 32, 32>}, {pipeline_mode = #tpu.pipeline_mode<synchronous>, transform_indices = @transform_2, window_bounds = array<i64: 4, 32, 1>}, {transform_indices = @transform_3, window_bounds = array<i64: 2, 128>}]} {
    %c0 = arith.constant 0 : index
    %c0_0 = arith.constant 0 : index
    %0 = vector.load %arg1[%c0, %c0_0] : memref<4x128xf32, #tpu.memory_space<vmem>>, vector<4x128xf32>
    %c0_1 = arith.constant 0 : index
    %c0_2 = arith.constant 0 : index
    %c0_3 = arith.constant 0 : index
    %1 = vector.load %arg2[%c0_1, %c0_2, %c0_3] : memref<4x32x32xf32, #tpu.memory_space<vmem>>, vector<1x32x32xf32>
    %2 = vector.shape_cast %1 : vector<1x32x32xf32> to vector<32x32xf32>
    %3 = vector.extract_strided_slice %2 {offsets = [0, 0], sizes = [32, 4], strides = [1, 1]} : vector<32x32xf32> to vector<32x4xf32>
    %cst = arith.constant dense<0.000000e+00> : vector<32x128xf32>
    %4 = tpu.matmul %3, %0, %cst {dimension_numbers = #tpu.dot_dimension_numbers<[1], [0], [0], [1], [0, 0, 1, 1], [], []>} : vector<32x4xf32>, vector<4x128xf32>, vector<32x128xf32> -> vector<32x128xf32>
    %c0_4 = arith.constant 0 : index
    %c0_5 = arith.constant 0 : index
    %c0_6 = arith.constant 0 : index
    %5 = vector.load %arg3[%c0_4, %c0_5, %c0_6] : memref<4x32x1xf32, #tpu.memory_space<vmem>>, vector<1x32x1xf32>
    %6 = vector.shape_cast %5 : vector<1x32x1xf32> to vector<32x1xf32>
    %7 = vector.broadcast %6 : vector<32x1xf32> to vector<32x128xf32>
    %8 = arith.addf %4, %7 : vector<32x128xf32>
    %cst_7 = arith.constant 0.000000e+00 : f32
    %9 = vector.broadcast %cst_7 : f32 to vector<32x128xf32>
    %10 = arith.maximumf %8, %9 : vector<32x128xf32>
    %c1 = arith.constant 1 : index
    %c0_8 = arith.constant 0 : index
    %c0_9 = arith.constant 0 : index
    %11 = vector.load %arg2[%c1, %c0_8, %c0_9] : memref<4x32x32xf32, #tpu.memory_space<vmem>>, vector<1x32x32xf32>
    %12 = vector.shape_cast %11 : vector<1x32x32xf32> to vector<32x32xf32>
    %cst_10 = arith.constant dense<0.000000e+00> : vector<32x128xf32>
    %13 = tpu.matmul %12, %10, %cst_10 {dimension_numbers = #tpu.dot_dimension_numbers<[1], [0], [0], [1], [0, 0, 1, 1], [], []>} : vector<32x32xf32>, vector<32x128xf32>, vector<32x128xf32> -> vector<32x128xf32>
    %c1_11 = arith.constant 1 : index
    %c0_12 = arith.constant 0 : index
    %c0_13 = arith.constant 0 : index
    %14 = vector.load %arg3[%c1_11, %c0_12, %c0_13] : memref<4x32x1xf32, #tpu.memory_space<vmem>>, vector<1x32x1xf32>
    %15 = vector.shape_cast %14 : vector<1x32x1xf32> to vector<32x1xf32>
    %16 = vector.broadcast %15 : vector<32x1xf32> to vector<32x128xf32>
    %17 = arith.addf %13, %16 : vector<32x128xf32>
    %cst_14 = arith.constant 0.000000e+00 : f32
    %18 = vector.broadcast %cst_14 : f32 to vector<32x128xf32>
    %19 = arith.maximumf %17, %18 : vector<32x128xf32>
    %c2 = arith.constant 2 : index
    %c0_15 = arith.constant 0 : index
    %c0_16 = arith.constant 0 : index
    %20 = vector.load %arg2[%c2, %c0_15, %c0_16] : memref<4x32x32xf32, #tpu.memory_space<vmem>>, vector<1x32x32xf32>
    %21 = vector.shape_cast %20 : vector<1x32x32xf32> to vector<32x32xf32>
    %cst_17 = arith.constant dense<0.000000e+00> : vector<32x128xf32>
    %22 = tpu.matmul %21, %19, %cst_17 {dimension_numbers = #tpu.dot_dimension_numbers<[1], [0], [0], [1], [0, 0, 1, 1], [], []>} : vector<32x32xf32>, vector<32x128xf32>, vector<32x128xf32> -> vector<32x128xf32>
    %c2_18 = arith.constant 2 : index
    %c0_19 = arith.constant 0 : index
    %c0_20 = arith.constant 0 : index
    %23 = vector.load %arg3[%c2_18, %c0_19, %c0_20] : memref<4x32x1xf32, #tpu.memory_space<vmem>>, vector<1x32x1xf32>
    %24 = vector.shape_cast %23 : vector<1x32x1xf32> to vector<32x1xf32>
    %25 = vector.broadcast %24 : vector<32x1xf32> to vector<32x128xf32>
    %26 = arith.addf %22, %25 : vector<32x128xf32>
    %cst_21 = arith.constant 0.000000e+00 : f32
    %27 = vector.broadcast %cst_21 : f32 to vector<32x128xf32>
    %28 = arith.maximumf %26, %27 : vector<32x128xf32>
    %c3 = arith.constant 3 : index
    %c0_22 = arith.constant 0 : index
    %c0_23 = arith.constant 0 : index
    %29 = vector.load %arg2[%c3, %c0_22, %c0_23] : memref<4x32x32xf32, #tpu.memory_space<vmem>>, vector<1x32x32xf32>
    %30 = vector.shape_cast %29 : vector<1x32x32xf32> to vector<32x32xf32>
    %cst_24 = arith.constant dense<0.000000e+00> : vector<32x128xf32>
    %31 = tpu.matmul %30, %28, %cst_24 {dimension_numbers = #tpu.dot_dimension_numbers<[1], [0], [0], [1], [0, 0, 1, 1], [], []>} : vector<32x32xf32>, vector<32x128xf32>, vector<32x128xf32> -> vector<32x128xf32>
    %c3_25 = arith.constant 3 : index
    %c0_26 = arith.constant 0 : index
    %c0_27 = arith.constant 0 : index
    %32 = vector.load %arg3[%c3_25, %c0_26, %c0_27] : memref<4x32x1xf32, #tpu.memory_space<vmem>>, vector<1x32x1xf32>
    %33 = vector.shape_cast %32 : vector<1x32x1xf32> to vector<32x1xf32>
    %34 = vector.broadcast %33 : vector<32x1xf32> to vector<32x128xf32>
    %35 = arith.addf %31, %34 : vector<32x128xf32>
    %36 = vector.extract_strided_slice %35 {offsets = [0, 0], sizes = [2, 128], strides = [1, 1]} : vector<32x128xf32> to vector<2x128xf32>
    %c0_28 = arith.constant 0 : index
    %c0_29 = arith.constant 0 : index
    %37 = vector.load %arg4[%c0_28, %c0_29] : memref<2x128xf32, #tpu.memory_space<vmem>>, vector<2x128xf32>
    tpu.vector_store %arg4[%c0_28, %c0_29], %36 {strides = array<i32>} : memref<2x128xf32, #tpu.memory_space<vmem>>, vector<2x128xf32>,
    return
  }
  func.func @transform_0(%arg0: i32) -> (i32, i32) {
    %c0_i32 = arith.constant 0 : i32
    %c0_i32_0 = arith.constant 0 : i32
    return %c0_i32, %arg0 : i32, i32
  }
  func.func @transform_1(%arg0: i32) -> (i32, i32, i32) {
    %c0_i32 = arith.constant 0 : i32
    %c0_i32_0 = arith.constant 0 : i32
    %c0_i32_1 = arith.constant 0 : i32
    %c0_i32_2 = arith.constant 0 : i32
    return %c0_i32, %c0_i32_0, %c0_i32_1 : i32, i32, i32
  }
  func.func @transform_2(%arg0: i32) -> (i32, i32, i32) {
    %c0_i32 = arith.constant 0 : i32
    %c0_i32_0 = arith.constant 0 : i32
    %c0_i32_1 = arith.constant 0 : i32
    %c0_i32_2 = arith.constant 0 : i32
    return %c0_i32, %c0_i32_0, %c0_i32_1 : i32, i32, i32
  }
  func.func @transform_3(%arg0: i32) -> (i32, i32) {
    %c0_i32 = arith.constant 0 : i32
    %c0_i32_0 = arith.constant 0 : i32
    return %c0_i32, %arg0 : i32, i32
  }
}

</mosaic_0001>

<bundles_post_ra>
// kernel: tpu_custom_call.1
= control target key start
LH: loop header
LB: loop body
LE: loop exit
PB: predicated region body
PF: predicated region fallthrough
CT: control target
= control target key end

     0   :  { %vm57_vm0 = vcmask 1043456   ;;  %v399_v3 = vmov 0   ;;  %vm44_vm1 = vcmask 31744   ;;  %s530_s0 = inlined_call_operand.vmem [shape: f32[4,128], index: 0, kind: input, shape index: {}]   ;;  %s531_s1 = inlined_call_operand.vmem [shape: f32[4,32,32], index: 1, kind: input, shape index: {}]   ;;  %s532_s2 = inlined_call_operand.vmem [shape: f32[4,32,1], index: 2, kind: input, shape index: {}]   ;;  %s533_s3 = inlined_call_operand.hbm [shape: f32[2,128], index: 3, kind: output, shape index: {}]  }
   0x1   :  { %v15_v0 = vld [vmem:[%s530_s0] sm:$0xf]  ;;  %v23_v1 = vld [vmem:[%s532_s2 + $0x18] sm:$0xff]  ;;  %370 = vset.pattern.permute.xlu0 %v399_v3  ;;  %v21_v4 = vld [vmem:[%s532_s2 + $0x8] sm:$0xff]  ;;  %371 = vset.pattern.permute.xlu1 %v399_v3 }
   0x2   :  { %v16_v2 = vld [vmem:[%s531_s1] sm:$0xff]  ;;  %327 = vmatpush.msk.msra.mxu0 %vm57_vm0, %v15_v0  ;;  %41 = vperm.xlu0 %370, %v23_v1  }
   0x3   :  { %328 = vmatmul.msk.f32.vlgmr.msra.gmra.mxu0 %vm44_vm1, %v16_v2  ;;  %372 = vset.pattern.permute.xlu2 %v399_v3 }
   0x4   :  { %31 = vperm.xlu1 %371, %v21_v4  }
   0x5   :  { %8 = vsyncpa [#allocation3], 0  ;;  %v22_v5 = vld [vmem:[%s532_s2 + $0x10] sm:$0xff]  ;;  %v17_v6 = vld [vmem:[%s531_s1 + $0x8] sm:$0xff]  ;;  %vm124_vm2 = vcmask 261120   ;;  %s400_s15 = smov [#allocation2]  }
   0x6   :  { %v20_v7 = vld [vmem:[%s532_s2] sm:$0xff]  ;;  %v337_v8 = vld [vmem:[%s532_s2 + $0x28] sm:$0xff]  ;;  %v18_v9 = vld [vmem:[%s531_s1 + $0x10] sm:$0xff]  ;;  %s316_s16 = sshll.u32 %s400_s15, 4  ;;  %s318_s19 = sshll.u32 %s533_s3, 4  ;;  %s317_s16 = int_to_ptr.vmem [resolvable:$true] %s316_s16  ;;  %s319_s19 = int_to_ptr.hbm [resolvable:$true] %s318_s19 }
   0x7   :  { %v336_v10 = vld [vmem:[%s532_s2 + $0x20] sm:$0xff]  ;;  %v350_v11 = vld [vmem:[%s532_s2 + $0x50] sm:$0xff]  ;;  %v19_v12 = vld [vmem:[%s531_s1 + $0x18] sm:$0xff] }
   0x8   :  { %v349_v13 = vld [vmem:[%s532_s2 + $0x48] sm:$0xff]  ;;  %v360_v14 = vld [vmem:[%s532_s2 + $0x60] sm:$0xff]  ;;  %v339_v27 = vld [vmem:[%s532_s2 + $0x38] sm:$0xff] }
   0x9   :  { %121 = vperm.xlu2 %372, %v339_v27   ;;  %v332_v32 = vld [vmem:[%s531_s1 + $0x20] sm:$0xff]  ;;  %v338_v33 = vld [vmem:[%s532_s2 + $0x30] sm:$0xff]  ;;  %v333_v34 = vld [vmem:[%s531_s1 + $0x28] sm:$0xff] }
   0xa   :  { %36 = vperm.xlu0 %370, %v22_v5   ;;  %v351_v35 = vld [vmem:[%s532_s2 + $0x58] sm:$0xff]  ;;  %v334_v36 = vld [vmem:[%s531_s1 + $0x30] sm:$0xff]  ;;  %v348_v37 = vld [vmem:[%s532_s2 + $0x40] sm:$0xff] }
   0xb   :  { %329 = vmatmul.msk.f32.gmra.mxu0 %vm44_vm1, %v17_v6  ;;  %v335_v38 = vld [vmem:[%s531_s1 + $0x38] sm:$0xff]  ;;  %v344_v55 = vld [vmem:[%s531_s1 + $0x40] sm:$0xff]  ;;  %v345_v56 = vld [vmem:[%s531_s1 + $0x48] sm:$0xff] }
   0xc   :  { %26 = vperm.xlu1 %371, %v20_v7   ;;  %v346_v57 = vld [vmem:[%s531_s1 + $0x50] sm:$0xff]  ;;  %v347_v58 = vld [vmem:[%s531_s1 + $0x58] sm:$0xff] }
  0x11   :  { %116 = vperm.xlu2 %372, %v338_v33  }
  0x12   :  { %111 = vperm.xlu0 %370, %v337_v8  }
  0x13   :  { %330 = vmatmul.msk.f32.gmra.mxu0 %vm44_vm1, %v18_v9 }
  0x14   :  { %106 = vperm.xlu1 %371, %v336_v10  }
  0x19   :  { %197 = vperm.xlu2 %372, %v351_v35  }
  0x1a   :  { %192 = vperm.xlu0 %370, %v350_v11   ;;  %v356_v11 = vld [vmem:[%s531_s1 + $0x60] sm:$0xff] }
  0x1b   :  { %331 = vmatmul.msk.f32.gmra.mxu0 %vm44_vm1, %v19_v12  ;;  %v357_v12 = vld [vmem:[%s531_s1 + $0x68] sm:$0xff] }
  0x1c   :  { %187 = vperm.xlu1 %371, %v349_v13   ;;  %v358_v13 = vld [vmem:[%s531_s1 + $0x70] sm:$0xff] }
  0x21   :  { %182 = vperm.xlu2 %372, %v348_v37  }
  0x22   :  { %257 = vperm.xlu0 %370, %v360_v14   ;;  %v359_v14 = vld [vmem:[%s531_s1 + $0x78] sm:$0xff] }
  0x63   :  { %v122_v41 = vpop.permute.xlu2 %121 }
  0x6b   :  { %v117_v43 = vpop.permute.xlu2 %116 }
  0x73   :  { %v198_v62 = vpop.permute.xlu2 %197 }
  0x74   :  { %v42_v17 = vpop.permute.xlu0 %41 }
  0x76   :  { %v32_v18 = vpop.permute.xlu1 %31 }
  0x7b   :  { %v183_v6 = vpop.permute.xlu2 %182 }
  0x7c   :  { %v37_v20 = vpop.permute.xlu0 %36 }
  0x7e   :  { %v27_v24 = vpop.permute.xlu1 %26 }
  0x80   :  { %v78_v15 = vpop.f32.mrf.mxu0 }
  0x81   :  { %v79_v28 = vadd.f32 %v78_v15, %v27_v24 }
  0x83   :  { %v90_v31 = vmax.f32 %v79_v28, 0.0 }
  0x84   :  { %v112_v47 = vpop.permute.xlu0 %111 }
  0x86   :  { %v107_v50 = vpop.permute.xlu1 %106 }
  0x88   :  { %v81_v16 = vpop.f32.mrf.mxu0 }
  0x89   :  { %v82_v25 = vadd.f32 %v81_v16, %v32_v18 }
  0x8b   :  { %v91_v30 = vmax.f32 %v82_v25, 0.0 }
  0x8c   :  { %v193_v63 = vpop.permute.xlu0 %192 }
  0x8e   :  { %v188_v3 = vpop.permute.xlu1 %187 }
  0x90   :  { %v84_v19 = vpop.f32.mrf.mxu0 }
  0x91   :  { %v85_v22 = vadd.f32 %v84_v19, %v37_v20 }
  0x93   :  { %v92_v29 = vmax.f32 %v85_v22, 0.0 }
  0x94   :  { %v258_v15 = vpop.permute.xlu0 %257 }
  0x98   :  { %v87_v21 = vpop.f32.mrf.mxu0 }
  0x99   :  { %v88_v23 = vadd.f32 %v87_v21, %v42_v17 }
  0x9b   :  { %v93_v26 = vmax.f32 %v88_v23, 0.0 }
  0x9d   :  { %149 = vmatpush.msra.mxu1 %v93_v26 }
  0x9f   :  { %150 = vmatpush.msra.mxu1 %v92_v29 }
  0xa1   :  { %151 = vmatpush.msra.mxu1 %v91_v30 }
  0xa3   :  { %152 = vmatpush.msra.mxu1 %v90_v31 }
  0xa4   :  { %340 = vmatmul.msk.f32.vlgmr.msra.gmra.mxu1 %vm124_vm2, %v332_v32 }
  0xac   :  { %341 = vmatmul.msk.f32.gmra.mxu1 %vm124_vm2, %v333_v34 }
  0xb4   :  { %342 = vmatmul.msk.f32.gmra.mxu1 %vm124_vm2, %v334_v36 }
  0xbc   :  { %343 = vmatmul.msk.f32.gmra.mxu1 %vm124_vm2, %v335_v38 }
 0x121   :  { %v154_v39 = vpop.f32.mrf.mxu1 }
 0x122   :  { %v155_v51 = vadd.f32 %v154_v39, %v107_v50 }
 0x124   :  { %v166_v54 = vmax.f32 %v155_v51, 0.0 }
 0x129   :  { %v157_v40 = vpop.f32.mrf.mxu1 }
 0x12a   :  { %v158_v48 = vadd.f32 %v157_v40, %v112_v47 }
 0x12c   :  { %v167_v53 = vmax.f32 %v158_v48, 0.0 }
 0x131   :  { %v160_v42 = vpop.f32.mrf.mxu1 }
 0x132   :  { %v161_v45 = vadd.f32 %v160_v42, %v117_v43 }
 0x134   :  { %v168_v52 = vmax.f32 %v161_v45, 0.0 }
 0x139   :  { %v163_v44 = vpop.f32.mrf.mxu1 }
 0x13a   :  { %v164_v46 = vadd.f32 %v163_v44, %v122_v41 }
 0x13c   :  { %v169_v49 = vmax.f32 %v164_v46, 0.0 }
 0x13e   :  { %224 = vmatpush.msra.mxu2 %v169_v49 }
 0x140   :  { %225 = vmatpush.msra.mxu2 %v168_v52 }
 0x142   :  { %226 = vmatpush.msra.mxu2 %v167_v53 }
 0x144   :  { %227 = vmatpush.msra.mxu2 %v166_v54 }
 0x145   :  { %352 = vmatmul.msk.f32.vlgmr.msra.gmra.mxu2 %vm124_vm2, %v344_v55 }
 0x14d   :  { %353 = vmatmul.msk.f32.gmra.mxu2 %vm124_vm2, %v345_v56 }
 0x155   :  { %354 = vmatmul.msk.f32.gmra.mxu2 %vm124_vm2, %v346_v57 }
 0x15d   :  { %355 = vmatmul.msk.f32.gmra.mxu2 %vm124_vm2, %v347_v58 }
 0x1c8   :  { %v229_v59 = vpop.f32.mrf.mxu2 }
 0x1c9   :  { %v230_v7 = vadd.f32 %v229_v59, %v183_v6 }
 0x1cb   :  { %v241_v10 = vmax.f32 %v230_v7, 0.0 }
 0x1d0   :  { %v232_v60 = vpop.f32.mrf.mxu2 }
 0x1d1   :  { %v233_v4 = vadd.f32 %v232_v60, %v188_v3 }
 0x1d3   :  { %v242_v9 = vmax.f32 %v233_v4, 0.0 }
 0x1d8   :  { %v235_v61 = vpop.f32.mrf.mxu2 }
 0x1d9   :  { %v236_v1 = vadd.f32 %v235_v61, %v193_v63 }
 0x1db   :  { %v243_v8 = vmax.f32 %v236_v1, 0.0 }
 0x1e0   :  { %v238_v0 = vpop.f32.mrf.mxu2 }
 0x1e1   :  { %v239_v2 = vadd.f32 %v238_v0, %v198_v62 }
 0x1e3   :  { %v244_v5 = vmax.f32 %v239_v2, 0.0 }
 0x1e5   :  { %296 = vmatpush.msra.mxu3 %v244_v5 }
 0x1e7   :  { %297 = vmatpush.msra.mxu3 %v243_v8 }
 0x1e9   :  { %298 = vmatpush.msra.mxu3 %v242_v9 }
 0x1eb   :  { %299 = vmatpush.msra.mxu3 %v241_v10 }
 0x1ec   :  { %364 = vmatmul.msk.f32.vlgmr.msra.gmra.mxu3 %vm124_vm2, %v356_v11 }
 0x1f4   :  { %365 = vmatmul.msk.f32.gmra.mxu3 %vm124_vm2, %v357_v12 }
 0x1fc   :  { %366 = vmatmul.msk.f32.gmra.mxu3 %vm124_vm2, %v358_v13 }
 0x204   :  { %367 = vmatmul.msk.f32.gmra.mxu3 %vm124_vm2, %v359_v14 }
 0x26f   :  { %v301_v16 = vpop.f32.mrf.mxu3 }
 0x270   :  { %v302_v17 = vadd.f32 %v301_v16, %v258_v15 }
 0x272   :  { %310 = vst [vmem:[#allocation2] sm:$0x3] %v302_v17 }
 0x273   :  { %321 = dma.vmem_to_hbm [thread:$0]  %s317_s16, 32, %s319_s19, [#allocation3]  }
 0x277   :  { %v304_v18 = vpop.f32.mrf.mxu3 }
 0x27f   :  { %v306_v19 = vpop.f32.mrf.mxu3 }
 0x287   :  { %v308_v20 = vpop.f32.mrf.mxu3 }
 0x288   :  { %397 = dma.done.wait [#allocation3], 32  }
 0x289   :  { %398 = vsyncadd [#allocation3], 4294967264 }
 0x28a   :  { %326 = vsyncpa [#allocation3], 1 }

</bundles_post_ra>
